<compile_context>
chip_gen: v6e
topology: v6e:2x2x1
jax: 0.10.0
libtpu: 0.0.40
codegen_flags: <defaults>
</compile_context>

<pallas_src>
import jax
import jax.numpy as jnp
from jax.experimental import pallas as pl
from jax.experimental.pallas import tpu as pltpu

OC = 64      # conv out channels
K = 3        # conv kernel size
H = 32       # fc1 hidden size (logical)
HP = 128     # fc1 hidden size padded to full lane width


# --------------------------------------------------------------------------
# Fused kernel: conv1d(k=3,p=1) + ReLU + maxpool(2,2) + fc1 + ReLU + fc2
# --------------------------------------------------------------------------
def cnn1d_fused_kernel(x_ref, m_ref, cb_ref, w1_ref, b1_ref, w2_ref, b2_ref,
                       out_ref):
    x = x_ref[...]                                                    # (bm, F) bf16

    # conv1d at even/odd output positions as ONE matmul against [M_even | M_odd];
    # output columns of each half are already channel-major (c*P + p), i.e. the
    # PyTorch flatten order.
    y = jnp.dot(x, m_ref[...], preferred_element_type=jnp.float32)   # (bm, 2*NF)
    nf = y.shape[-1] // 2                                             # static
    y_even = y[:, :nf]
    y_odd = y[:, nf:]

    # MaxPool1d(2,2) + shared bias + ReLU:  relu(max(a,b) + cb) == max(relu(a+cb),
    # relu(b+cb))  (bias shared between the two pooled positions).
    pooled = jnp.maximum(jnp.maximum(y_even, y_odd) + cb_ref[...], 0.0)  # (bm, NF) f32

    # fc1 (hidden padded to 128 lanes) + ReLU.  Padded columns of w1/b1 are zero,
    # so padded lanes of h are exactly zero.
    h = jnp.dot(pooled.astype(w1_ref.dtype), w1_ref[...],
                preferred_element_type=jnp.float32) + b1_ref[...]     # (bm, 128)
    h = jnp.maximum(h, 0.0)

    # fc2 as VPU multiply + lane reduce (w2 row is zero beyond lane H).
    out = jnp.sum(h * w2_ref[...], axis=-1, keepdims=True) + b2_ref[...]  # (bm, 1)

    # Lane-dense store: broadcast the scalar-per-row result across all 128 lanes;
    # the wrapper slices [:, :1].
    out_ref[...] = jnp.broadcast_to(out, out_ref.shape)


# --------------------------------------------------------------------------
# Fold the conv weights into one dense matrix (weight prep, done in the wrapper)
# --------------------------------------------------------------------------
def _conv_as_matmul(conv_w, conv_b, F):
    """Conv1d(1->OC, k=3, pad=1) restricted to even / odd output positions,
    expressed as a single dense (F, 2*OC*P) matrix [M_even | M_odd] whose columns
    (within each half) are in channel-major (c*P + p) order, plus the bias row."""
    P = F // 2
    wt = conv_w.T                                    # (K, OC)
    i_idx = jnp.arange(F)[:, None]                   # input position
    p_idx = jnp.arange(P)[None, :]                   # pooled output position

    def build(offset):
        k = i_idx - 2 * p_idx + offset               # tap index, (F, P)
        valid = (k >= 0) & (k < K)
        kc = jnp.clip(k, 0, K - 1)
        m = jnp.where(valid[:, :, None], wt[kc], 0.0)   # (F, P, OC)
        return jnp.transpose(m, (0, 2, 1)).reshape(F, OC * P)

    m_cat = jnp.concatenate([build(1), build(0)], axis=1)   # [even | odd], (F, 2*NF)
    b_rep = jnp.repeat(conv_b, P).reshape(1, OC * P)         # bias in c*P+p order
    return m_cat, b_rep


# --------------------------------------------------------------------------
# Wrapper (jitted so all weight-prep glue fuses into the same program)
# --------------------------------------------------------------------------
@jax.jit
def cnn1d_forward(x, params):
    conv_w, conv_b, fc1_w, fc1_b, fc2_w, fc2_b = params
    B, C, F = x.shape
    assert C == 1 and F % 2 == 0
    P = F // 2
    NF = OC * P
    Hd = fc1_w.shape[1]
    assert Hd <= HP

    # Conv folded into a single dense RHS; cast the big operands to bf16
    # (accumulation stays f32 inside the kernel via preferred_element_type).
    m_cat, cb = _conv_as_matmul(conv_w, conv_b, F)
    m_cat = m_cat.astype(jnp.bfloat16)                 # (F, 2*NF)
    xsq = x[:, 0, :].astype(jnp.bfloat16)              # (B, F)

    # Zero-pad the hidden dim 32 -> 128 so fc1's output slab is lane-dense.
    w1 = jnp.zeros((NF, HP), jnp.bfloat16).at[:, :Hd].set(fc1_w.astype(jnp.bfloat16))
    b1 = jnp.zeros((1, HP), jnp.float32).at[:, :Hd].set(fc1_b)
    w2_row = jnp.zeros((1, HP), jnp.float32).at[:, :Hd].set(fc2_w[:, 0][None, :])

    # Batch tile: whole batch per step for small B; for large B pick >= 2 steps
    # (both v7x TensorCores) with at most ~512 rows per step.
    if B <= 256:
        bm = B
    else:
        bm = pl.cdiv(B, max(2, pl.cdiv(B, 512)))
    grid = (pl.cdiv(B, bm),)
    const = lambda i: (0, 0)                           # weights resident across grid

    out = pl.pallas_call(
        cnn1d_fused_kernel,
        out_shape=jax.ShapeDtypeStruct((B, HP), jnp.float32),
        grid=grid,
        in_specs=[
            pl.BlockSpec((bm, F), lambda i: (i, 0)),   # x rows for this block (bf16)
            pl.BlockSpec((F, 2 * NF), const),          # [M_even | M_odd] (bf16)
            pl.BlockSpec((1, NF), const),              # conv bias (c*P+p order, f32)
            pl.BlockSpec((NF, HP), const),             # fc1_w padded (bf16)
            pl.BlockSpec((1, HP), const),              # fc1_b padded (f32)
            pl.BlockSpec((1, HP), const),              # fc2_w as padded row (f32)
            pl.BlockSpec((1, 1), const),               # fc2_b (f32)
        ],
        out_specs=pl.BlockSpec((bm, HP), lambda i: (i, 0)),
        compiler_params=pltpu.CompilerParams(
            dimension_semantics=("parallel",) if grid[0] > 1 else ("arbitrary",)),
    )(xsq, m_cat, cb, w1, b1, w2_row, fc2_b)

    return out[:, :1]                                  # (B, 1)


# --------------------------------------------------------------------------
# Deterministic parameter init (PyTorch-style uniform(-1/sqrt(fan_in), ...))
# --------------------------------------------------------------------------
def init_params(key, num_features):
    nflat = OC * (num_features // 2)
    ks = jax.random.split(key, 6)

    def u(k, shape, fan_in):
        bound = 1.0 / (fan_in ** 0.5)
        return jax.random.uniform(k, shape, jnp.float32, -bound, bound)

    conv_w = u(ks[0], (OC, K), 1 * K)        # PyTorch conv1.weight (64,1,3) squeezed
    conv_b = u(ks[1], (OC,), 1 * K)
    fc1_w = u(ks[2], (nflat, H), nflat)      # PyTorch fc1.weight (32, nflat), transposed
    fc1_b = u(ks[3], (1, H), nflat)
    fc2_w = u(ks[4], (H, 1), H)              # PyTorch fc2.weight (1, 32), transposed
    fc2_b = u(ks[5], (1, 1), H)
    return conv_w, conv_b, fc1_w, fc1_b, fc2_w, fc2_b


# --------------------------------------------------------------------------
# Pure-JAX f32 reference of the same forward (sanity check)
# --------------------------------------------------------------------------
def reference_forward(x, params):
    conv_w, conv_b, fc1_w, fc1_b, fc2_w, fc2_b = params
    B, _, F = x.shape
    xpad = jnp.pad(x[:, 0, :], ((0, 0), (1, 1)))
    patches = jnp.stack([xpad[:, k:k + F] for k in range(3)], axis=-1)   # (B, F, 3)
    conv = jnp.einsum("blk,ck->bcl", patches, conv_w) + conv_b[None, :, None]
    y = jax.nn.relu(conv)
    pooled = jnp.max(y.reshape(B, OC, F // 2, 2), axis=-1)
    flat = pooled.reshape(B, -1)
    h = jax.nn.relu(flat @ fc1_w + fc1_b)
    return h @ fc2_w + fc2_b


if __name__ == "__main__":
    num_features = 16
    batch = 2

    key = jax.random.PRNGKey(0)
    kx, kp = jax.random.split(key)
    x = jax.random.normal(kx, (batch, 1, num_features), dtype=jnp.float32)
    params = init_params(kp, num_features)

    out = cnn1d_forward(x, params)
    out = jax.block_until_ready(out)

    ref = reference_forward(x, params)
    assert out.shape == (batch, 1)
    # bf16 weights/activations in the kernel vs the f32 reference -> loosened tol.
    assert jnp.allclose(out, ref, rtol=2e-2, atol=2e-2), (out, ref)

    print("KERNEL_OK")
</pallas_src>

<mosaic_0001>
module attributes {stable_mosaic.version = 11 : i64} {
  func.func @cnn1d_fused_kernel(%arg0: i32, %arg1: memref<2x16xbf16, #tpu.memory_space<vmem>>, %arg2: memref<16x1024xbf16, #tpu.memory_space<vmem>>, %arg3: memref<1x512xf32, #tpu.memory_space<vmem>>, %arg4: memref<512x128xbf16, #tpu.memory_space<vmem>>, %arg5: memref<1x128xf32, #tpu.memory_space<vmem>>, %arg6: memref<1x128xf32, #tpu.memory_space<vmem>>, %arg7: memref<1x1xf32, #tpu.memory_space<vmem>>, %arg8: memref<2x128xf32, #tpu.memory_space<vmem>>) attributes {dimension_semantics = [#tpu.dimension_semantics<arbitrary>], iteration_bounds = array<i64: 1>, scalar_prefetch = 0 : i64, scratch_operands = 0 : i64, tpu.core_type = #tpu.core_type<tc>, window_params = [{transform_indices = @transform_0, window_bounds = array<i64: 2, 16>}, {pipeline_mode = #tpu.pipeline_mode<synchronous>, transform_indices = @transform_1, window_bounds = array<i64: 16, 1024>}, {pipeline_mode = #tpu.pipeline_mode<synchronous>, transform_indices = @transform_2, window_bounds = array<i64: 1, 512>}, {pipeline_mode = #tpu.pipeline_mode<synchronous>, transform_indices = @transform_3, window_bounds = array<i64: 512, 128>}, {pipeline_mode = #tpu.pipeline_mode<synchronous>, transform_indices = @transform_4, window_bounds = array<i64: 1, 128>}, {pipeline_mode = #tpu.pipeline_mode<synchronous>, transform_indices = @transform_5, window_bounds = array<i64: 1, 128>}, {pipeline_mode = #tpu.pipeline_mode<synchronous>, transform_indices = @transform_6, window_bounds = array<i64: 1, 1>}, {transform_indices = @transform_7, window_bounds = array<i64: 2, 128>}]} {
    %c0 = arith.constant 0 : index
    %c0_0 = arith.constant 0 : index
    %0 = vector.load %arg1[%c0, %c0_0] : memref<2x16xbf16, #tpu.memory_space<vmem>>, vector<2x16xbf16>
    %c0_1 = arith.constant 0 : index
    %c0_2 = arith.constant 0 : index
    %1 = vector.load %arg2[%c0_1, %c0_2] : memref<16x1024xbf16, #tpu.memory_space<vmem>>, vector<16x1024xbf16>
    %cst = arith.constant dense<0.000000e+00> : vector<2x1024xf32>
    %2 = tpu.matmul %0, %1, %cst {dimension_numbers = #tpu.dot_dimension_numbers<[1], [0], [0], [1], [0, 0, 1, 1], [], []>} : vector<2x16xbf16>, vector<16x1024xbf16>, vector<2x1024xf32> -> vector<2x1024xf32>
    %3 = vector.extract_strided_slice %2 {offsets = [0, 0], sizes = [2, 512], strides = [1, 1]} : vector<2x1024xf32> to vector<2x512xf32>
    %4 = vector.extract_strided_slice %2 {offsets = [0, 512], sizes = [2, 512], strides = [1, 1]} : vector<2x1024xf32> to vector<2x512xf32>
    %5 = arith.maximumf %3, %4 : vector<2x512xf32>
    %c0_3 = arith.constant 0 : index
    %c0_4 = arith.constant 0 : index
    %6 = vector.load %arg3[%c0_3, %c0_4] : memref<1x512xf32, #tpu.memory_space<vmem>>, vector<1x512xf32>
    %7 = vector.broadcast %6 : vector<1x512xf32> to vector<2x512xf32>
    %8 = arith.addf %5, %7 : vector<2x512xf32>
    %cst_5 = arith.constant 0.000000e+00 : f32
    %9 = vector.broadcast %cst_5 : f32 to vector<2x512xf32>
    %10 = arith.maximumf %8, %9 : vector<2x512xf32>
    %11 = arith.truncf %10 : vector<2x512xf32> to vector<2x512xbf16>
    %c0_6 = arith.constant 0 : index
    %c0_7 = arith.constant 0 : index
    %12 = vector.load %arg4[%c0_6, %c0_7] : memref<512x128xbf16, #tpu.memory_space<vmem>>, vector<512x128xbf16>
    %cst_8 = arith.constant dense<0.000000e+00> : vector<2x128xf32>
    %13 = tpu.matmul %11, %12, %cst_8 {dimension_numbers = #tpu.dot_dimension_numbers<[1], [0], [0], [1], [0, 0, 1, 1], [], []>} : vector<2x512xbf16>, vector<512x128xbf16>, vector<2x128xf32> -> vector<2x128xf32>
    %c0_9 = arith.constant 0 : index
    %c0_10 = arith.constant 0 : index
    %14 = vector.load %arg5[%c0_9, %c0_10] : memref<1x128xf32, #tpu.memory_space<vmem>>, vector<1x128xf32>
    %15 = vector.broadcast %14 : vector<1x128xf32> to vector<2x128xf32>
    %16 = arith.addf %13, %15 : vector<2x128xf32>
    %cst_11 = arith.constant 0.000000e+00 : f32
    %17 = vector.broadcast %cst_11 : f32 to vector<2x128xf32>
    %18 = arith.maximumf %16, %17 : vector<2x128xf32>
    %c0_12 = arith.constant 0 : index
    %c0_13 = arith.constant 0 : index
    %19 = vector.load %arg6[%c0_12, %c0_13] : memref<1x128xf32, #tpu.memory_space<vmem>>, vector<1x128xf32>
    %20 = vector.broadcast %19 : vector<1x128xf32> to vector<2x128xf32>
    %21 = arith.mulf %18, %20 : vector<2x128xf32>
    %cst_14 = arith.constant dense<0.000000e+00> : vector<2xf32>
    %22 = vector.multi_reduction <add>, %21, %cst_14 [1] : vector<2x128xf32> to vector<2xf32>
    %23 = vector.shape_cast %22 : vector<2xf32> to vector<2x1xf32>
    %c0_15 = arith.constant 0 : index
    %c0_16 = arith.constant 0 : index
    %24 = vector.load %arg7[%c0_15, %c0_16] : memref<1x1xf32, #tpu.memory_space<vmem>>, vector<1x1xf32>
    %25 = vector.broadcast %24 : vector<1x1xf32> to vector<2x1xf32>
    %26 = arith.addf %23, %25 : vector<2x1xf32>
    %27 = vector.shape_cast %26 : vector<2x1xf32> to vector<2x1xf32>
    %28 = vector.broadcast %27 : vector<2x1xf32> to vector<2x128xf32>
    %c0_17 = arith.constant 0 : index
    %c0_18 = arith.constant 0 : index
    %29 = vector.load %arg8[%c0_17, %c0_18] : memref<2x128xf32, #tpu.memory_space<vmem>>, vector<2x128xf32>
    tpu.vector_store %arg8[%c0_17, %c0_18], %28 {strides = array<i32>} : memref<2x128xf32, #tpu.memory_space<vmem>>, vector<2x128xf32>,
    return
  }
  func.func @transform_0(%arg0: i32) -> (i32, i32) {
    %c0_i32 = arith.constant 0 : i32
    %c0_i32_0 = arith.constant 0 : i32
    return %arg0, %c0_i32 : i32, i32
  }
  func.func @transform_1(%arg0: i32) -> (i32, i32) {
    %c0_i32 = arith.constant 0 : i32
    %c0_i32_0 = arith.constant 0 : i32
    %c0_i32_1 = arith.constant 0 : i32
    return %c0_i32, %c0_i32_0 : i32, i32
  }
  func.func @transform_2(%arg0: i32) -> (i32, i32) {
    %c0_i32 = arith.constant 0 : i32
    %c0_i32_0 = arith.constant 0 : i32
    %c0_i32_1 = arith.constant 0 : i32
    return %c0_i32, %c0_i32_0 : i32, i32
  }
  func.func @transform_3(%arg0: i32) -> (i32, i32) {
    %c0_i32 = arith.constant 0 : i32
    %c0_i32_0 = arith.constant 0 : i32
    %c0_i32_1 = arith.constant 0 : i32
    return %c0_i32, %c0_i32_0 : i32, i32
  }
  func.func @transform_4(%arg0: i32) -> (i32, i32) {
    %c0_i32 = arith.constant 0 : i32
    %c0_i32_0 = arith.constant 0 : i32
    %c0_i32_1 = arith.constant 0 : i32
    return %c0_i32, %c0_i32_0 : i32, i32
  }
  func.func @transform_5(%arg0: i32) -> (i32, i32) {
    %c0_i32 = arith.constant 0 : i32
    %c0_i32_0 = arith.constant 0 : i32
    %c0_i32_1 = arith.constant 0 : i32
    return %c0_i32, %c0_i32_0 : i32, i32
  }
  func.func @transform_6(%arg0: i32) -> (i32, i32) {
    %c0_i32 = arith.constant 0 : i32
    %c0_i32_0 = arith.constant 0 : i32
    %c0_i32_1 = arith.constant 0 : i32
    return %c0_i32, %c0_i32_0 : i32, i32
  }
  func.func @transform_7(%arg0: i32) -> (i32, i32) {
    %c0_i32 = arith.constant 0 : i32
    %c0_i32_0 = arith.constant 0 : i32
    return %arg0, %c0_i32 : i32, i32
  }
}

</mosaic_0001>

<bundles_post_ra>
// kernel: cnn1d_forward.1
= control target key start
LH: loop header
LB: loop body
LE: loop exit
PB: predicated region body
PF: predicated region fallthrough
CT: control target
= control target key end

     0   :  { %v783_v3 = vmov 0   ;;  %vm78_vm0 = vcmask 130048   ;;  %v252_v50 = vlaneseq  ;;  %vm636_vm1 = vcmask 1041408   ;;  %s966_s1 = inlined_call_operand.vmem [shape: bf16[16,1024], index: 1, kind: input, shape index: {}]   ;;  %s967_s0 = inlined_call_operand.vmem [shape: bf16[2,16], index: 0, kind: input, shape index: {}]   ;;  %s968_s3 = inlined_call_operand.vmem [shape: bf16[512,128], index: 3, kind: input, shape index: {}]   ;;  %s969_s2 = inlined_call_operand.vmem [shape: f32[1,512], index: 2, kind: input, shape index: {}]   ;;  %s970_s6 = inlined_call_operand.<no memory space> [shape: f32[1,1], index: 6, kind: input, shape index: {}]   ;;  %s971_s4 = inlined_call_operand.vmem [shape: f32[1,128], index: 4, kind: input, shape index: {}]   ;;  %s972_s5 = inlined_call_operand.vmem [shape: f32[1,128], index: 5, kind: input, shape index: {}]   ;;  %s973_s7 = inlined_call_operand.vmem [shape: f32[2,128], index: 7, kind: output, shape index: {}]  }
   0x1   :  { %v30_v0 = vld [vmem:[%s966_s1] sm:$0xff]  ;;  %v31_v2 = vld [vmem:[%s966_s1 + $0x8] sm:$0xff]  ;;  %114 = vmatprep.mubr.bf16.mxu0 %v783_v3  ;;  %155 = vmatprep.mubr.bf16.mxu1 %v783_v3  ;;  %v32_v7 = vld [vmem:[%s966_s1 + $0x10] sm:$0xff] }
   0x2   :  { %v34_v1 = vld [vmem:[%s966_s1 + $0x20] sm:$0xff]  ;;  %v35_v5 = vld [vmem:[%s966_s1 + $0x28] sm:$0xff]  ;;  %750 = vset.pattern.permute.xlu0 %v783_v3  ;;  %v36_v10 = vld [vmem:[%s966_s1 + $0x30] sm:$0xff]  ;;  %v253_v51 = vshrl.u32 %v252_v50, 7 }
   0x3   :  { %v659_v4 = vcombine.high %v30_v0, %v34_v1  ;;  %v658_v6 = vcombine.low %v30_v0, %v34_v1  ;;  %v661_v8 = vcombine.high %v31_v2, %v35_v5  ;;  %v660_v9 = vcombine.low %v31_v2, %v35_v5  ;;  %v33_v11 = vld [vmem:[%s966_s1 + $0x18] sm:$0xff]  ;;  %v29_v15 = vld [vmem:[%s967_s0] sm:$0x1]  ;;  %v755_v22 = vld [vmem:[%s968_s3 + $0x70] sm:$0xff]  }
   0x4   :  { %v37_v12 = vld [vmem:[%s966_s1 + $0x38] sm:$0xff]  ;;  %v663_v13 = vcombine.high %v32_v7, %v36_v10  ;;  %v662_v16 = vcombine.low %v32_v7, %v36_v10  ;;  %v756_v23 = vld [vmem:[%s968_s3 + $0xf0] sm:$0xff]   ;;  %v759_v26 = vld [vmem:[%s968_s3 + $0x68] sm:$0xff]   ;;  %v254_v56 = vsub.s32 0, %v253_v51  ;;  %v262_v59 = vsub.s32 2, %v253_v51 }
   0x5   :  { %96 = vmatprep.subr.bf16.mxu0 %v659_v4  ;;  %v665_v14 = vcombine.high %v33_v11, %v37_v12  ;;  %137 = vmatprep.subr.bf16.mxu1 %v661_v8  ;;  %v664_v17 = vcombine.low %v33_v11, %v37_v12  ;;  %v751_v18 = vld [vmem:[%s968_s3 + $0x78] sm:$0xff]   ;;  %v757_v24 = vld [vmem:[%s968_s3 + $0x30] sm:$0xff]   ;;  %v760_v27 = vld [vmem:[%s968_s3 + $0xe8] sm:$0xff]   ;;  %v258_v61 = vsub.s32 1, %v253_v51  ;;  %v266_v63 = vsub.s32 3, %v253_v51 }
   0x6   :  { %97 = vmatpush1.bf16.msra.mxu0 %v658_v6  ;;  %138 = vmatpush1.bf16.msra.mxu1 %v660_v9  ;;  %v752_v19 = vld [vmem:[%s968_s3 + $0xf8] sm:$0xff]   ;;  %v758_v25 = vld [vmem:[%s968_s3 + $0xb0] sm:$0xff]   ;;  %v761_v28 = vld [vmem:[%s968_s3 + $0x28] sm:$0xff]  }
   0x7   :  { %178 = vmatprep.subr.bf16.mxu0 %v663_v13  ;;  %219 = vmatprep.subr.bf16.mxu1 %v665_v14  ;;  %v753_v20 = vld [vmem:[%s968_s3 + $0x38] sm:$0xff]   ;;  %v762_v29 = vld [vmem:[%s968_s3 + $0xa8] sm:$0xff]   ;;  %v763_v30 = vld [vmem:[%s968_s3 + $0x60] sm:$0xff]  }
   0x8   :  { %v754_v21 = vld [vmem:[%s968_s3 + $0xb8] sm:$0xff]   ;;  %v764_v31 = vld [vmem:[%s968_s3 + $0xe0] sm:$0xff]   ;;  %v771_v38 = vld [vmem:[%s968_s3 + $0x50] sm:$0xff]  }
   0x9   :  { %666 = vmatmul.mubr.msk.bf16.vlgmr.msra.gmra.mxu0 %vm78_vm0, %v29_v15  ;;  %667 = vmatmul.mubr.msk.bf16.vlgmr.msra.gmra.mxu1 %vm78_vm0, %v29_v15  ;;  %v765_v32 = vld [vmem:[%s968_s3 + $0x20] sm:$0xff]   ;;  %v767_v34 = vld [vmem:[%s968_s3 + $0x58] sm:$0xff]   ;;  %v772_v39 = vld [vmem:[%s968_s3 + $0xd0] sm:$0xff]  }
   0xa   :  { %179 = vmatpush1.bf16.msra.mxu0 %v662_v16  ;;  %220 = vmatpush1.bf16.msra.mxu1 %v664_v17  ;;  %v766_v33 = vld [vmem:[%s968_s3 + $0xa0] sm:$0xff]   ;;  %v768_v35 = vld [vmem:[%s968_s3 + $0xd8] sm:$0xff]   ;;  %v773_v40 = vld [vmem:[%s968_s3 + $0x10] sm:$0xff]  }
   0xb   :  { %196 = vmatprep.mubr.bf16.mxu0 %v783_v3  ;;  %237 = vmatprep.mubr.bf16.mxu1 %v783_v3  ;;  %v769_v36 = vld [vmem:[%s968_s3 + $0x18] sm:$0xff]   ;;  %v774_v41 = vld [vmem:[%s968_s3 + $0x90] sm:$0xff]   ;;  %v775_v42 = vld [vmem:[%s968_s3 + $0x48] sm:$0xff]  }
   0xc   :  { %705 = vmatprep.subr.bf16.mxu0 %v751_v18  ;;  %727 = vmatprep.subr.bf16.mxu1 %v752_v19  ;;  %v770_v37 = vld [vmem:[%s968_s3 + $0x98] sm:$0xff]   ;;  %v776_v43 = vld [vmem:[%s968_s3 + $0xc8] sm:$0xff]   ;;  %v779_v46 = vld [vmem:[%s968_s3 + $0x40] sm:$0xff]  }
   0xd   :  { %v777_v44 = vld [vmem:[%s968_s3 + $0x8] sm:$0xff]   ;;  %v780_v47 = vld [vmem:[%s968_s3 + $0xc0] sm:$0xff]  }
   0xe   :  { %v778_v45 = vld [vmem:[%s968_s3 + $0x88] sm:$0xff]   ;;  %v781_v48 = vld [vmem:[%s968_s3] sm:$0xff]  }
   0xf   :  { %v782_v49 = vld [vmem:[%s968_s3 + $0x80] sm:$0xff]  }
  0x10   :  { %v250_v58 = vld [vmem:[%s969_s2] sm:$0xf] }
  0x11   :  { %668 = vmatmul.mubr.msk.bf16.vlgmr.msra.gmra.mxu0 %vm78_vm0, %v29_v15  ;;  %669 = vmatmul.mubr.msk.bf16.vlgmr.msra.gmra.mxu1 %vm78_vm0, %v29_v15  ;;  %v255_v1 = vrot.slane %v250_v58, %v254_v56  ;;  %v263_v3 = vrot.slane %v250_v58, %v262_v59  ;;  %v259_v6 = vrot.slane %v250_v58, %v258_v61 }
  0x12   :  { %706 = vmatpush3.bf16.msra.mxu0 %v753_v20  ;;  %728 = vmatpush3.bf16.msra.mxu1 %v754_v21  ;;  %v267_v9 = vrot.slane %v250_v58, %v266_v63 }
  0x13   :  { %707 = vmatprep.subr.bf16.mxu0 %v755_v22  ;;  %729 = vmatprep.subr.bf16.mxu1 %v756_v23 }
  0x16   :  { %708 = vmatpush3.bf16.msra.mxu0 %v757_v24  ;;  %730 = vmatpush3.bf16.msra.mxu1 %v758_v25 }
  0x17   :  { %709 = vmatprep.subr.bf16.mxu0 %v759_v26  ;;  %731 = vmatprep.subr.bf16.mxu1 %v760_v27 }
  0x1a   :  { %710 = vmatpush3.bf16.msra.mxu0 %v761_v28  ;;  %732 = vmatpush3.bf16.msra.mxu1 %v762_v29  ;;  %v12_v29 = vstv %s970_s6 }
  0x1b   :  { %711 = vmatprep.subr.bf16.mxu0 %v763_v30  ;;  %733 = vmatprep.subr.bf16.mxu1 %v764_v31  ;;  %13 = vst [vmem:[#allocation2] sm:$0x1] %v12_v29 }
  0x1e   :  { %712 = vmatpush3.bf16.msra.mxu0 %v765_v32  ;;  %734 = vmatpush3.bf16.msra.mxu1 %v766_v33  ;;  %v670_v32 = vld [vmem:[%s971_s4] ss:$0 sm:$0xff] }
  0x1f   :  { %713 = vmatprep.subr.bf16.mxu0 %v767_v34  ;;  %735 = vmatprep.subr.bf16.mxu1 %v768_v35 }
  0x22   :  { %714 = vmatpush3.bf16.msra.mxu0 %v769_v36  ;;  %736 = vmatpush3.bf16.msra.mxu1 %v770_v37 }
  0x23   :  { %715 = vmatprep.subr.bf16.mxu0 %v771_v38  ;;  %737 = vmatprep.subr.bf16.mxu1 %v772_v39 }
  0x26   :  { %716 = vmatpush3.bf16.msra.mxu0 %v773_v40  ;;  %738 = vmatpush3.bf16.msra.mxu1 %v774_v41 }
  0x27   :  { %717 = vmatprep.subr.bf16.mxu0 %v775_v42  ;;  %739 = vmatprep.subr.bf16.mxu1 %v776_v43  ;;  %v703_v43 = vld [vmem:[%s972_s5] ss:$0 sm:$0xff] }
  0x2a   :  { %718 = vmatpush3.bf16.msra.mxu0 %v777_v44  ;;  %740 = vmatpush3.bf16.msra.mxu1 %v778_v45 }
  0x2b   :  { %719 = vmatprep.subr.bf16.mxu0 %v779_v46  ;;  %741 = vmatprep.subr.bf16.mxu1 %v780_v47  ;;  %v704_v47 = vld [vmem:[#allocation2] ss:$0 sm:$0xff] }
  0x2e   :  { %720 = vmatpush3.bf16.msra.mxu0 %v781_v48  ;;  %742 = vmatpush3.bf16.msra.mxu1 %v782_v49 }
  0xc9   :  { %v116_v52 = vpop.f32.mrf.mxu0  ;;  %v157_v53 = vpop.f32.mrf.mxu1 }
  0xcb   :  { %v118_v54 = vpop.f32.mrf.mxu0  ;;  %v159_v55 = vpop.f32.mrf.mxu1 }
  0xcd   :  { %v120_v57 = vpop.f32.mrf.mxu0  ;;  %v161_v60 = vpop.f32.mrf.mxu1 }
  0xcf   :  { %v121_v62 = vpop.f32.mrf.mxu0  ;;  %v162_v0 = vpop.f32.mrf.mxu1 }
  0xd1   :  { %v198_v2 = vpop.f32.mrf.mxu0  ;;  %v239_v5 = vpop.f32.mrf.mxu1 }
  0xd2   :  { %v246_v4 = vmax.f32 %v116_v52, %v198_v2  ;;  %v248_v7 = vmax.f32 %v157_v53, %v239_v5 }
  0xd3   :  { %v200_v8 = vpop.f32.mrf.mxu0  ;;  %v241_v12 = vpop.f32.mrf.mxu1 }
  0xd4   :  { %v272_v10 = vadd.f32 %v255_v1, %v246_v4  ;;  %v247_v11 = vmax.f32 %v118_v54, %v200_v8  ;;  %v274_v13 = vadd.f32 %v263_v3, %v248_v7  ;;  %v249_v14 = vmax.f32 %v159_v55, %v241_v12 }
  0xd5   :  { %v202_v15 = vpop.f32.mrf.mxu0  ;;  %v243_v17 = vpop.f32.mrf.mxu1 }
  0xd6   :  { %v273_v16 = vadd.f32 %v259_v6, %v247_v11  ;;  %v276_v18 = vmax.f32 %v272_v10, 0.0  ;;  %v275_v19 = vadd.f32 %v267_v9, %v249_v14  ;;  %v278_v21 = vmax.f32 %v274_v13, 0.0 }
  0xd7   :  { %v203_v20 = vpop.f32.mrf.mxu0  ;;  %v244_v23 = vpop.f32.mrf.mxu1 }
  0xd8   :  { %v277_v22 = vmax.f32 %v273_v16, 0.0  ;;  %v279_v24 = vmax.f32 %v275_v19, 0.0  ;;  %v280_v26 = vpack.c.bf16 %v276_v18, %v276_v18  ;;  %v282_v28 = vpack.c.bf16 %v278_v21, %v278_v21 }
  0xda   :  { %v281_v25 = vpack.c.bf16 %v277_v22, %v277_v22  ;;  %v283_v27 = vpack.c.bf16 %v279_v24, %v279_v24 }
  0xdc   :  { %579 = vmatprep.mubr.bf16.mxu0 %v281_v25  ;;  %619 = vmatprep.mubr.bf16.mxu1 %v283_v27 }
  0xdd   :  { %580 = vmatmul.mubr.bf16.vlgmr.msra.gmra.mxu0 %v280_v26  ;;  %620 = vmatmul.mubr.bf16.vlgmr.msra.gmra.mxu1 %v282_v28 }
 0x19d   :  { %v721_v30 = vpop.f32.mrf.mxu0  ;;  %v743_v31 = vpop.f32.mrf.mxu1 }
 0x19f   :  { %v722_v33 = vpop.f32.mrf.mxu0  ;;  %v744_v35 = vpop.f32.mrf.mxu1 }
 0x1a0   :  { %v723_v34 = vadd.f32 %v722_v33, %v721_v30  ;;  %v745_v38 = vadd.f32 %v744_v35, %v743_v31 }
 0x1a1   :  { %v724_v36 = vpop.f32.mrf.mxu0  ;;  %v746_v39 = vpop.f32.mrf.mxu1 }
 0x1a2   :  { %v582_v37 = vadd.f32 %v723_v34, %v670_v32 }
 0x1a3   :  { %v725_v40 = vpop.f32.mrf.mxu0  ;;  %v747_v42 = vpop.f32.mrf.mxu1 }
 0x1a4   :  { %v622_v41 = vadd.f32 %v745_v38, %v582_v37 }
 0x1a6   :  { %v627_v44 = vmax.f32 %v622_v41, 0.0 }
 0x1a8   :  { %v635_v45 = vmul.f32 %v703_v43, %v627_v44 }
 0x1aa   :  { %v637_v46 = vsel %vm636_vm1, %v635_v45, 0.0 }
 0x1ab   :  { %638 = vadd.xlane.f32.xlu0 %v637_v46 }
 0x234   :  { %v639_v48 = vpop.xlane.xlu0 %638 }
 0x235   :  { %v647_v49 = vadd.f32 %v704_v47, %v639_v48 }
 0x237   :  { %650 = vperm.xlu0 %750, %v647_v49  }
 0x2b2   :  { %v651_v50 = vpop.permute.xlu0 %650 }
 0x2b3   :  { %653 = vst [vmem:[%s973_s7] sm:$0x3] %v651_v50 }

</bundles_post_ra>
